<compile_context>
chip_gen: v6e
topology: v6e:2x2x1
jax: 0.10.0
libtpu: 0.0.40
codegen_flags: <defaults>
</compile_context>

<pallas_src>
import jax
import jax.numpy as jnp
from jax.experimental import pallas as pl
from jax.experimental.pallas import tpu as pltpu


def _round_up(x, m):
    return ((x + m - 1) // m) * m


def _pad2(a, rows, cols):
    r, c = a.shape
    if r == rows and c == cols:
        return a
    return jnp.pad(a, ((0, rows - r), (0, cols - c)))


def mlp_kernel(x_ref, w1_ref, b1_ref, w2_ref, b2_ref, w3_ref, b3_ref, o_ref):
    # All three layers fused in one grid step: intermediates never touch HBM.
    x = x_ref[...]
    # Layer 1: Linear + ReLU (MXU matmul, f32 accumulation; bias/ReLU in f32).
    h = jnp.dot(x, w1_ref[...], preferred_element_type=jnp.float32)
    h = jnp.maximum(h + b1_ref[...], 0.0)
    # Layer 2: Linear + ReLU
    h = jnp.dot(h.astype(w2_ref.dtype), w2_ref[...],
                preferred_element_type=jnp.float32)
    h = jnp.maximum(h + b2_ref[...], 0.0)
    # Layer 3: Linear (no activation)
    h = jnp.dot(h.astype(w3_ref.dtype), w3_ref[...],
                preferred_element_type=jnp.float32)
    o_ref[...] = (h + b3_ref[...]).astype(o_ref.dtype)


def mlp_forward(x, w1, b1, w2, b2, w3, b3, *, block_batch=512, compute_dtype=None):
    """Fused MLP forward. compute_dtype=jnp.bfloat16 enables the bf16 MXU path
    (v6e/v7x); accumulation, bias-add and ReLU stay in float32."""
    batch, input_dim = x.shape
    hidden1 = w1.shape[1]
    hidden2 = w2.shape[1]
    output_dim = w3.shape[1]

    # Lane-dense feature dims (multiples of 128): full MXU tiles, unmasked vst.
    d_in = _round_up(input_dim, 128)
    d_h1 = _round_up(hidden1, 128)
    d_h2 = _round_up(hidden2, 128)
    d_out = _round_up(output_dim, 128)

    # Batch tile: multiple of 8 (sublane), capped at block_batch; the grid
    # pipelines the rest (x/out DMAs double-buffered behind compute).
    tb = min(_round_up(block_batch, 8), _round_up(batch, 8))
    padded_batch = _round_up(batch, tb)
    grid = (padded_batch // tb,)

    mm_dtype = compute_dtype if compute_dtype is not None else x.dtype

    # Zero padding is exact: padded input cols multiply zero weight rows, padded
    # activation cols get bias 0 -> ReLU(0)=0 -> contribute nothing downstream.
    xp = _pad2(x, padded_batch, d_in).astype(mm_dtype)
    w1p = _pad2(w1, d_in, d_h1).astype(mm_dtype)
    w2p = _pad2(w2, d_h1, d_h2).astype(mm_dtype)
    w3p = _pad2(w3, d_h2, d_out).astype(mm_dtype)
    # Biases stay f32 (f32 VPU fast path everywhere, incl. v5e).
    b1p = _pad2(b1.reshape(1, -1), 1, d_h1).astype(jnp.float32)
    b2p = _pad2(b2.reshape(1, -1), 1, d_h2).astype(jnp.float32)
    b3p = _pad2(b3.reshape(1, -1), 1, d_out).astype(jnp.float32)

    # Constant index_map -> block stays VMEM-resident across the whole grid.
    const = lambda shape: pl.BlockSpec(shape, lambda i, _s=shape: (0,) * len(_s))

    # TODO(synk): for realistic widths (hidden >= 4096) add a reduction grid
    # axis over the hidden dims and set vmem_limit_bytes for v7x's 64 MiB VMEM.
    out_padded = pl.pallas_call(
        mlp_kernel,
        out_shape=jax.ShapeDtypeStruct((padded_batch, d_out), jnp.float32),
        grid=grid,
        in_specs=[
            pl.BlockSpec((tb, d_in), lambda i: (i, 0)),
            const((d_in, d_h1)), const((1, d_h1)),
            const((d_h1, d_h2)), const((1, d_h2)),
            const((d_h2, d_out)), const((1, d_out)),
        ],
        out_specs=pl.BlockSpec((tb, d_out), lambda i: (i, 0)),
        compiler_params=pltpu.CompilerParams(
            # Batch axis is independent -> shard across both TCs on v7x.
            dimension_semantics=("parallel",),
        ),
    )(xp, w1p, b1p, w2p, b2p, w3p, b3p)

    return out_padded[:batch, :output_dim]


def init_linear(key, in_dim, out_dim):
    # PyTorch nn.Linear default init: U(-1/sqrt(in_dim), 1/sqrt(in_dim)).
    kw, kb = jax.random.split(key)
    bound = 1.0 / jnp.sqrt(jnp.float32(in_dim))
    # Stored as [in, out] for x @ W.
    w = jax.random.uniform(kw, (in_dim, out_dim), jnp.float32, -bound, bound)
    b = jax.random.uniform(kb, (1, out_dim), jnp.float32, -bound, bound)
    return w, b


if __name__ == "__main__":
    input_dim, hidden_dim, output_dim = 32, 32, 16
    batch = 64

    key = jax.random.PRNGKey(0)
    kx, k1, k2, k3 = jax.random.split(key, 4)

    x = jax.random.normal(kx, (batch, input_dim), jnp.float32)
    w1, b1 = init_linear(k1, input_dim, hidden_dim)
    w2, b2 = init_linear(k2, hidden_dim, hidden_dim)
    w3, b3 = init_linear(k3, hidden_dim, output_dim)

    # Small block_batch=16 here (-> 4 grid steps) purely to exercise the
    # pipelined multi-step path at demo sizes; real workloads use the
    # default block_batch>=512.
    out = mlp_forward(x, w1, b1, w2, b2, w3, b3, block_batch=16)
    jax.block_until_ready(out)

    # Reference check in plain JAX (same math, f32).
    ref = jnp.maximum(x @ w1 + b1, 0.0)
    ref = jnp.maximum(ref @ w2 + b2, 0.0)
    ref = ref @ w3 + b3
    assert out.shape == (batch, output_dim)
    assert jnp.allclose(out, ref, atol=1e-5, rtol=1e-5), "mismatch vs reference (f32)"

    # Optional bf16 MXU path (v6e/v7x fast path); f32 accumulation so the
    # error vs the f32 reference stays small.
    out_bf16 = mlp_forward(x, w1, b1, w2, b2, w3, b3, block_batch=16,
                           compute_dtype=jnp.bfloat16)
    jax.block_until_ready(out_bf16)
    assert out_bf16.shape == (batch, output_dim)
    assert jnp.allclose(out_bf16, ref, atol=5e-2, rtol=5e-2), "mismatch vs reference (bf16)"

    print("KERNEL_OK")
</pallas_src>

<mosaic_0001>
module attributes {stable_mosaic.version = 11 : i64} {
  func.func @mlp_kernel(%arg0: i32, %arg1: memref<16x128xf32, #tpu.memory_space<vmem>>, %arg2: memref<128x128xf32, #tpu.memory_space<vmem>>, %arg3: memref<1x128xf32, #tpu.memory_space<vmem>>, %arg4: memref<128x128xf32, #tpu.memory_space<vmem>>, %arg5: memref<1x128xf32, #tpu.memory_space<vmem>>, %arg6: memref<128x128xf32, #tpu.memory_space<vmem>>, %arg7: memref<1x128xf32, #tpu.memory_space<vmem>>, %arg8: memref<16x128xf32, #tpu.memory_space<vmem>>) attributes {dimension_semantics = [#tpu.dimension_semantics<parallel>], iteration_bounds = array<i64: 4>, scalar_prefetch = 0 : i64, scratch_operands = 0 : i64, tpu.core_type = #tpu.core_type<tc>, window_params = [{transform_indices = @transform_0, window_bounds = array<i64: 16, 128>}, {pipeline_mode = #tpu.pipeline_mode<synchronous>, transform_indices = @transform_1, window_bounds = array<i64: 128, 128>}, {pipeline_mode = #tpu.pipeline_mode<synchronous>, transform_indices = @transform_2, window_bounds = array<i64: 1, 128>}, {pipeline_mode = #tpu.pipeline_mode<synchronous>, transform_indices = @transform_3, window_bounds = array<i64: 128, 128>}, {pipeline_mode = #tpu.pipeline_mode<synchronous>, transform_indices = @transform_4, window_bounds = array<i64: 1, 128>}, {pipeline_mode = #tpu.pipeline_mode<synchronous>, transform_indices = @transform_5, window_bounds = array<i64: 128, 128>}, {pipeline_mode = #tpu.pipeline_mode<synchronous>, transform_indices = @transform_6, window_bounds = array<i64: 1, 128>}, {transform_indices = @transform_7, window_bounds = array<i64: 16, 128>}]} {
    %c0 = arith.constant 0 : index
    %c0_0 = arith.constant 0 : index
    %0 = vector.load %arg1[%c0, %c0_0] : memref<16x128xf32, #tpu.memory_space<vmem>>, vector<16x128xf32>
    %c0_1 = arith.constant 0 : index
    %c0_2 = arith.constant 0 : index
    %1 = vector.load %arg2[%c0_1, %c0_2] : memref<128x128xf32, #tpu.memory_space<vmem>>, vector<128x128xf32>
    %cst = arith.constant dense<0.000000e+00> : vector<16x128xf32>
    %2 = tpu.matmul %0, %1, %cst {dimension_numbers = #tpu.dot_dimension_numbers<[1], [0], [0], [1], [0, 0, 1, 1], [], []>} : vector<16x128xf32>, vector<128x128xf32>, vector<16x128xf32> -> vector<16x128xf32>
    %c0_3 = arith.constant 0 : index
    %c0_4 = arith.constant 0 : index
    %3 = vector.load %arg3[%c0_3, %c0_4] : memref<1x128xf32, #tpu.memory_space<vmem>>, vector<1x128xf32>
    %4 = vector.broadcast %3 : vector<1x128xf32> to vector<16x128xf32>
    %5 = arith.addf %2, %4 : vector<16x128xf32>
    %cst_5 = arith.constant 0.000000e+00 : f32
    %6 = vector.broadcast %cst_5 : f32 to vector<16x128xf32>
    %7 = arith.maximumf %5, %6 : vector<16x128xf32>
    %c0_6 = arith.constant 0 : index
    %c0_7 = arith.constant 0 : index
    %8 = vector.load %arg4[%c0_6, %c0_7] : memref<128x128xf32, #tpu.memory_space<vmem>>, vector<128x128xf32>
    %cst_8 = arith.constant dense<0.000000e+00> : vector<16x128xf32>
    %9 = tpu.matmul %7, %8, %cst_8 {dimension_numbers = #tpu.dot_dimension_numbers<[1], [0], [0], [1], [0, 0, 1, 1], [], []>} : vector<16x128xf32>, vector<128x128xf32>, vector<16x128xf32> -> vector<16x128xf32>
    %c0_9 = arith.constant 0 : index
    %c0_10 = arith.constant 0 : index
    %10 = vector.load %arg5[%c0_9, %c0_10] : memref<1x128xf32, #tpu.memory_space<vmem>>, vector<1x128xf32>
    %11 = vector.broadcast %10 : vector<1x128xf32> to vector<16x128xf32>
    %12 = arith.addf %9, %11 : vector<16x128xf32>
    %cst_11 = arith.constant 0.000000e+00 : f32
    %13 = vector.broadcast %cst_11 : f32 to vector<16x128xf32>
    %14 = arith.maximumf %12, %13 : vector<16x128xf32>
    %c0_12 = arith.constant 0 : index
    %c0_13 = arith.constant 0 : index
    %15 = vector.load %arg6[%c0_12, %c0_13] : memref<128x128xf32, #tpu.memory_space<vmem>>, vector<128x128xf32>
    %cst_14 = arith.constant dense<0.000000e+00> : vector<16x128xf32>
    %16 = tpu.matmul %14, %15, %cst_14 {dimension_numbers = #tpu.dot_dimension_numbers<[1], [0], [0], [1], [0, 0, 1, 1], [], []>} : vector<16x128xf32>, vector<128x128xf32>, vector<16x128xf32> -> vector<16x128xf32>
    %c0_15 = arith.constant 0 : index
    %c0_16 = arith.constant 0 : index
    %17 = vector.load %arg7[%c0_15, %c0_16] : memref<1x128xf32, #tpu.memory_space<vmem>>, vector<1x128xf32>
    %18 = vector.broadcast %17 : vector<1x128xf32> to vector<16x128xf32>
    %19 = arith.addf %16, %18 : vector<16x128xf32>
    %c0_17 = arith.constant 0 : index
    %c0_18 = arith.constant 0 : index
    %20 = vector.load %arg8[%c0_17, %c0_18] : memref<16x128xf32, #tpu.memory_space<vmem>>, vector<16x128xf32>
    tpu.vector_store %arg8[%c0_17, %c0_18], %19 {strides = array<i32>} : memref<16x128xf32, #tpu.memory_space<vmem>>, vector<16x128xf32>,
    return
  }
  func.func @transform_0(%arg0: i32) -> (i32, i32) {
    %c0_i32 = arith.constant 0 : i32
    %c0_i32_0 = arith.constant 0 : i32
    return %arg0, %c0_i32 : i32, i32
  }
  func.func @transform_1(%arg0: i32) -> (i32, i32) {
    %c0_i32 = arith.constant 0 : i32
    %c0_i32_0 = arith.constant 0 : i32
    %c0_i32_1 = arith.constant 0 : i32
    return %c0_i32, %c0_i32_0 : i32, i32
  }
  func.func @transform_2(%arg0: i32) -> (i32, i32) {
    %c0_i32 = arith.constant 0 : i32
    %c0_i32_0 = arith.constant 0 : i32
    %c0_i32_1 = arith.constant 0 : i32
    return %c0_i32, %c0_i32_0 : i32, i32
  }
  func.func @transform_3(%arg0: i32) -> (i32, i32) {
    %c0_i32 = arith.constant 0 : i32
    %c0_i32_0 = arith.constant 0 : i32
    %c0_i32_1 = arith.constant 0 : i32
    return %c0_i32, %c0_i32_0 : i32, i32
  }
  func.func @transform_4(%arg0: i32) -> (i32, i32) {
    %c0_i32 = arith.constant 0 : i32
    %c0_i32_0 = arith.constant 0 : i32
    %c0_i32_1 = arith.constant 0 : i32
    return %c0_i32, %c0_i32_0 : i32, i32
  }
  func.func @transform_5(%arg0: i32) -> (i32, i32) {
    %c0_i32 = arith.constant 0 : i32
    %c0_i32_0 = arith.constant 0 : i32
    %c0_i32_1 = arith.constant 0 : i32
    return %c0_i32, %c0_i32_0 : i32, i32
  }
  func.func @transform_6(%arg0: i32) -> (i32, i32) {
    %c0_i32 = arith.constant 0 : i32
    %c0_i32_0 = arith.constant 0 : i32
    %c0_i32_1 = arith.constant 0 : i32
    return %c0_i32, %c0_i32_0 : i32, i32
  }
  func.func @transform_7(%arg0: i32) -> (i32, i32) {
    %c0_i32 = arith.constant 0 : i32
    %c0_i32_0 = arith.constant 0 : i32
    return %arg0, %c0_i32 : i32, i32
  }
}

</mosaic_0001>

<bundles_post_ra>
// kernel: tpu_custom_call.1
= control target key start
LH: loop header
LB: loop body
LE: loop exit
PB: predicated region body
PF: predicated region fallthrough
CT: control target
= control target key end

     0   :  { %s1482_s0 = inlined_call_operand.hbm [shape: f32[64,128], index: 0, kind: input, shape index: {}]   ;;  %s1483_s1 = inlined_call_operand.hbm [shape: f32[128,128], index: 1, kind: input, shape index: {}]   ;;  %s1484_s2 = inlined_call_operand.vmem [shape: f32[1,128], index: 2, kind: input, shape index: {}]   ;;  %s1485_s3 = inlined_call_operand.hbm [shape: f32[128,128], index: 3, kind: input, shape index: {}]   ;;  %s1486_s4 = inlined_call_operand.vmem [shape: f32[1,128], index: 4, kind: input, shape index: {}]   ;;  %s1487_s5 = inlined_call_operand.hbm [shape: f32[128,128], index: 5, kind: input, shape index: {}]   ;;  %s1488_s6 = inlined_call_operand.vmem [shape: f32[1,128], index: 6, kind: input, shape index: {}]   ;;  %s1489_s7 = inlined_call_operand.hbm [shape: f32[64,128], index: 7, kind: output, shape index: {}]  }
   0x1   :  { %1496 = sst [smem:[#allocation15_spill]] %s1483_s1 }
   0x2   :  { %12 = vsyncpa [#allocation3], 0 }
   0x3   :  { %14 = vsyncpa [#allocation3 + $0x1], 0 }
   0x4   :  { %15 = vsyncpa [#allocation6], 0 }
   0x5   :  { %16 = vsyncpa [#allocation9], 0 }
   0x6   :  { %17 = vsyncpa [#allocation4], 0 }
   0x7   :  { %19 = vsyncpa [#allocation4 + $0x1], 0  ;;  %s1255_s24 = smov 0   ;;  %s1257_s25 = smov 0  }
   0x8   :  { %s1259_s26 = smov 0   ;;  %s1261_s27 = smov 0  }
   0x9 LB: > { %s1276_s28 = sadd.s32 4294967295, %s1204_s27   ;;  %s761_s29 = sadd.s32 4294967294, %s1204_s27   ;;  %s1204_s27 = sphi %s1261_s27, %s1517_s27   ;;  %s1200_s26 = sphi %s1259_s26, %s1516_s26   ;;  %s1196_s25 = sphi %s1257_s25, %s1515_s25   ;;  %s1192_s24 = sphi %s1255_s24, %s1514_s24  }
   0xa   : > { %p45_p0 = scmp.ne.s32.totalorder %s1196_s25, %s1192_s24  ;;  %p1490_p1 = scmp.eq.s32.totalorder %s1276_s28, 0 }
   0xb   : > { %p195_p2 = scmp.eq.s32.totalorder %s1276_s28, 3  ;;  %p201_p3 = scmp.eq.s32.totalorder %s761_s29, 3 }
   0xc   : > { %p1285_p4 = por %p1490_p1, %p45_p0  ;;  %p762_p5 = scmp.ge.s32.totalorder %s1204_s27, 1 }
   0xd   : > { %p1290_p6 = por %p201_p3, %p45_p0  ;;  %p208_p7 = scmp.lt.s32.totalorder %s1204_s27, 5 }
   0xe   : > { %s1497_s30 = scalar_select %p1285_p4, 1, 0 }
   0xf   : > { %s1498_s8 = scalar_select %p1290_p6, 1, 0 }
  0x10   : > { %p1295_p8 = pnand %p762_p5, %p208_p7  ;;  %s1206_s10 = smov [#allocation5]  }
  0x11   : > { %s220_s11 = sshll.u32 %s1206_s10, 4  ;;  %s1207_s13 = smov [#allocation7]   ;;  %s221_s11 = int_to_ptr.vmem [resolvable:$true] %s220_s11 }
  0x12   : > { %s1499_s9 = scalar_select %p1295_p8, 1, 0 }
  0x13   : > { %p961_p9 = pneg %p1295_p8  ;;  %s236_s14 = sshll.u32 %s1207_s13, 4  ;;  %s237_s14 = int_to_ptr.vmem [resolvable:$true] %s236_s14 }
  0x14   : > { %s1208_s15 = smov [#allocation8]   ;;  %s1037_s17 = scalar_lea.vmem %s221_s11, 2048 }
  0x15   : > { %p1303_p10 = pnand %p961_p9, %p1490_p1  ;;  %s252_s16 = sshll.u32 %s1208_s15, 4  ;;  %s253_s16 = int_to_ptr.vmem [resolvable:$true] %s252_s16 }
  0x16   : > { %p1038_p12 = scmp.ne.s32.totalorder %s221_s11, %s1037_s17  ;;  %p1045_p3 = scmp.lt.s32.totalorder %s221_s11, %s221_s11 }
  0x17   : > { %p1028_p11 = pneg %p1303_p10  ;;  %p1046_p5 = scmp.lt.s32.totalorder %s1037_s17, %s1037_s17 }
  0x19   : > { %p1040_p13 = pnand %p1038_p12, %p1028_p11  ;;  %p1047_p7 = por %p1046_p5, %p1045_p3 }
  0x1b   : > { %p1041_p0 = pneg %p1040_p13 }
  0x1d   : > { %p1048_p9 = pnand %p1047_p7, %p1041_p0 }
  0x1f   : > { %1051 = shalt.err (!%p1048_p9)
}
  0x20   : > { %s1491_s18 = smov 128   ;;  %s1492_s19 = smov 8  }
  0x21   : > { %s1501_s1 = sld [smem:[#allocation15_spill]]  ;;  %s1063_s22 = scalar_lea.vmem %s237_s14, 2048 }
  0x22   : > { %p1064_p12 = scmp.ne.s32.totalorder %s237_s14, %s1063_s22  ;;  %p1071_p0 = scmp.lt.s32.totalorder %s237_s14, %s237_s14 }
  0x23   : > { %p1072_p5 = scmp.lt.s32.totalorder %s1063_s22, %s1063_s22 }
  0x24   : > { %p1066_p13 = pnand %p1064_p12, %p1028_p11 }
  0x25   : > { %p1073_p7 = por %p1072_p5, %p1071_p0 }
  0x26   : > { %p1067_p3 = pneg %p1066_p13 }
  0x27   : > { %964 = dma.hbm_to_vmem [thread:$0]  (!%p1303_p10), %s1501_s1, 2048, %s221_s11, [#allocation6], %s1491_s18, %s1491_s18, %s1492_s19  }
  0x28   : > { %p1074_p9 = pnand %p1073_p7, %p1067_p3 }
  0x2a   : > { %1077 = shalt.err (!%p1074_p9)
}
  0x2b   : > { %967 = dma.hbm_to_vmem [thread:$0]  (!%p1303_p10), %s1485_s3, 2048, %s237_s14, [#allocation6], %s1491_s18, %s1491_s18, %s1492_s19  }
  0x2c   : > { %s1089_s10 = scalar_lea.vmem %s253_s16, 2048  ;;  %p1097_p0 = scmp.lt.s32.totalorder %s253_s16, %s253_s16 }
  0x2d   : > { %p1090_p1 = scmp.ne.s32.totalorder %s253_s16, %s1089_s10  ;;  %p1098_p3 = scmp.lt.s32.totalorder %s1089_s10, %s1089_s10 }
  0x2f   : > { %p1092_p12 = pnand %p1090_p1, %p1028_p11  ;;  %p1099_p5 = por %p1098_p3, %p1097_p0 }
  0x31   : > { %p1093_p13 = pneg %p1092_p12 }
  0x33   : > { %p1100_p7 = pnand %p1099_p5, %p1093_p13 }
  0x35   : > { %1103 = shalt.err (!%p1100_p7)
}
  0x36   : > { %970 = dma.hbm_to_vmem [thread:$0]  (!%p1303_p10), %s1487_s5, 2048, %s253_s16, [#allocation9], %s1491_s18, %s1491_s18, %s1492_s19  }
  0x37   : > { %s1343_s14 = sadd.s32 1, %s1204_s27   ;;  %s32_s15 = sadd.s32 1, %s1200_s26 }
  0x38   : > { %s29_s12 = ssub.s32 %s1204_s27, %s1343_s14  ;;  %p39_p11 = scmp.ne.s32.totalorder %s1200_s26, %s1196_s25 }
  0x39   : > { %p30_p1 = scmp.eq.s32.totalorder %s29_s12, 0  ;;  %p40_p9 = scmp.eq.s32.totalorder %s1204_s27, 0 }
  0x3a   : > { %p982_p12 = scmp.lt.s32.totalorder %s1204_s27, 4  ;;  %p1357_p0 = por %p195_p2, %p39_p11 }
  0x3b   : > { %s1353_s17 = scalar_select %p30_p1, %s1200_s26, %s32_s15  }
  0x3c   : > { %p41_p13 = por %p40_p9, %p39_p11  ;;  %s269_s21 = sand.u32 1, %s1200_s26  }
  0x3d   : > { %s1502_s20 = scalar_select %p1357_p0, 1, 0 }
  0x3e   : > { %s784_s22 = sshll.u32 %s1204_s27, 8  ;;  %s767_s16 = sshll.u32 %s269_s21, 4 }
  0x3f   : > { %s1366_s10 = scalar_lea.hbm %s1482_s0, %s784_s22  ;;  %s273_s11 = scalar_lea.vmem [#allocation2], %s767_s16 }
  0x40   : > { %s280_s13 = sshll.u32 %s273_s11, 4  ;;  %p1368_p10 = pnand %p982_p12, %p41_p13  ;;  %s1372_s13 = int_to_ptr.vmem [resolvable:$true] %s280_s13 }
  0x41   : > { %s1374_s15 = scalar_lea.sflag [#allocation3], %s269_s21  ;;  %s1104_s18 = scalar_lea.hbm %s1366_s10, 256 }
  0x42   : > { %p1105_p2 = scmp.ne.s32.totalorder %s1366_s10, %s1104_s18  ;;  %p1106_p3 = pneg %p1368_p10 }
  0x43   : > { %s1109_s16 = scalar_lea.hbm %s1482_s0, 1024  ;;  %p1110_p1 = scmp.lt.s32.totalorder %s1366_s10, %s1482_s0 }
  0x44   : > { %p1107_p5 = pnand %p1106_p3, %p1105_p2  ;;  %p1111_p11 = scmp.lt.s32.totalorder %s1109_s16, %s1104_s18 }
  0x46   : > { %p1108_p7 = pneg %p1107_p5  ;;  %p1112_p9 = por %p1111_p11, %p1110_p1 }
  0x48   : > { %p1113_p12 = pnand %p1112_p9, %p1108_p7 }
  0x4a   : > { %1116 = shalt.err (!%p1113_p12)
}
  0x4b   : > { %s1117_s21 = scalar_lea.vmem %s1372_s13, 256  ;;  %s1211_s19 = smov [#allocation2]  }
  0x4c   : > { %p1118_p13 = scmp.ne.s32.totalorder %s1372_s13, %s1117_s21  ;;  %s1122_s1 = sshll.u32 %s1211_s19, 4  ;;  %s1123_s1 = int_to_ptr.vmem [resolvable:$false] %s1122_s1 }
  0x4d   : > { %s1124_s22 = scalar_lea.vmem %s1123_s1, 512  ;;  %p1125_p5 = scmp.lt.s32.totalorder %s1372_s13, %s1123_s1 }
  0x4e   : > { %p1120_p6 = pnand %p1118_p13, %p1106_p3  ;;  %p1126_p0 = scmp.lt.s32.totalorder %s1124_s22, %s1117_s21 }
  0x50   : > { %p1121_p2 = pneg %p1120_p6  ;;  %p1127_p4 = por %p1126_p0, %p1125_p5 }
  0x52   : > { %p1128_p8 = pnand %p1127_p4, %p1121_p2 }
  0x54   : > { %1131 = shalt.err (!%p1128_p8)
}
  0x55   : > { %s1504_s18 = smov 8   ;;  %s1505_s23 = smov 128  }
  0x56   : > { %974 = dma.hbm_to_vmem [thread:$0]  (!%p1368_p10), %s1366_s10, 256, %s1372_s13, %s1374_s15, %s1505_s23, %s1505_s23, %s1504_s18  }
  0x57   : > { %p1506_p6 = scmp.ne.s32.totalorder %s1499_s9, 0 }
  0x58   : > { %s1401_s19 = sand.u32 (!%p1506_p6), 1, %s1196_s25   ;;  %p1507_p4 = scmp.ne.s32.totalorder (!%p1506_p6), %s1497_s30, 0 }
  0x59   : > { %292 = sbr.rel (%p1506_p6) target bundleno = 746 (0x2ea), region = 48  ;;  %s771_s1 = sshll.u32 (!%p1506_p6), %s1401_s19, 4 }
  0x5a   : > { %s295_s16 = scalar_lea.sflag (!%p1506_p6), [#allocation3], %s1401_s19  ;;  %s1407_s12 = scalar_lea.vmem (!%p1506_p6), [#allocation2], %s771_s1 }
  0x5e   : > { %1175 = dma.done.wait (%p1507_p4), %s295_s16, 256  }
  0x5f   : > { %1177 = vsyncadd (%p1507_p4), %s295_s16, 4294967040  ;;  %p1508_p8 = scmp.eq.s32.totalorder %s1276_s28, 0 }
  0x61   : > { %1179 = dma.done.wait (%p1508_p8), [#allocation6], 4096   ;;  %p1509_p0 = pmov %p1508_p8 }
  0x63   : > { %1181 = vsyncadd (%p1509_p0), [#allocation6], 4294963200  ;;  %p1510_p10 = pmov %p1509_p0 }
  0x64   : > { %p1511_p3 = pmov %p1509_p0 }
  0x65   : > { %1183 = dma.done.wait (%p1510_p10), [#allocation9], 2048  }
  0x66   : > { %1185 = vsyncadd (%p1511_p3), [#allocation9], 4294965248  ;;  %v360_v0 = vld [vmem:[#allocation5 + $0x78] sm:$0xff]  ;;  %v359_v1 = vld [vmem:[#allocation5 + $0x70] sm:$0xff]  ;;  %s340_s11 = scalar_lea.vmem [#allocation10], %s771_s1  ;;  %s785_s22 = sshll.u32 %s1276_s28, 8 }
  0x67   : > { %840 = vmatprep.subr.mxu0 %v360_v0  ;;  %v358_v2 = vld [vmem:[#allocation5 + $0x68] sm:$0xff]  ;;  %v357_v3 = vld [vmem:[#allocation5 + $0x60] sm:$0xff]  ;;  %v356_v5 = vld [vmem:[#allocation5 + $0x58] sm:$0xff]  ;;  %s659_s21 = sshll.u32 %s340_s11, 4  ;;  %s1440_s16 = scalar_lea.hbm %s1489_s7, %s785_s22  ;;  %s1435_s21 = int_to_ptr.vmem [resolvable:$true] %s659_s21 }
  0x68   : > { %841 = vmatpush3.msra.mxu0 %v360_v0  ;;  %v343_v4 = vld [vmem:[%s1407_s12] sm:$0xff]  ;;  %v460_v6 = vld [vmem:[#allocation7 + $0x78] sm:$0xff]  ;;  %v458_v9 = vld [vmem:[#allocation7 + $0x68] sm:$0xff]  ;;  %s1132_s1 = scalar_lea.vmem %s1435_s21, 256  ;;  %p1512_p1 = scmp.ne.s32.totalorder %s1502_s20, 0 }
  0x69   : > { %842 = vmatprep.subr.mxu0 %v359_v1  ;;  %872 = vmatprep.mubr.f32.mxu0 %v343_v4  ;;  %v459_v7 = vld [vmem:[#allocation7 + $0x70] sm:$0xff]  ;;  %v354_v10 = vld [vmem:[#allocation5 + $0x48] sm:$0xff]  ;;  %v457_v11 = vld [vmem:[#allocation7 + $0x60] sm:$0xff]  ;;  %p1133_p7 = scmp.ne.s32.totalorder %s1435_s21, %s1132_s1  ;;  %s1212_s28 = smov [#allocation10]  }
  0x6a   : > { %843 = vmatpush3.msra.mxu0 %v359_v1  ;;  %875 = vmatprep.subr.mxu1 %v460_v6  ;;  %v355_v8 = vld [vmem:[#allocation5 + $0x50] sm:$0xff]  ;;  %v353_v12 = vld [vmem:[#allocation5 + $0x40] sm:$0xff]  ;;  %v456_v13 = vld [vmem:[#allocation7 + $0x58] sm:$0xff]  ;;  %s1136_s30 = sshll.u32 %s1212_s28, 4  ;;  %s1137_s30 = int_to_ptr.vmem [resolvable:$false] %s1136_s30 }
  0x6b   : > { %844 = vmatprep.subr.mxu0 %v358_v2  ;;  %876 = vmatpush3.msra.mxu1 %v460_v6  ;;  %v352_v14 = vld [vmem:[#allocation5 + $0x38] sm:$0xff]  ;;  %v455_v15 = vld [vmem:[#allocation7 + $0x50] sm:$0xff]  ;;  %v454_v17 = vld [vmem:[#allocation7 + $0x48] sm:$0xff]  ;;  %p1134_p11 = pnand %p1133_p7, %p1512_p1  ;;  %s1138_s9 = scalar_lea.vmem %s1137_s30, 512 }
  0x6c   : > { %845 = vmatpush3.msra.mxu0 %v358_v2  ;;  %877 = vmatprep.subr.mxu1 %v459_v7  ;;  %v351_v16 = vld [vmem:[#allocation5 + $0x30] sm:$0xff]  ;;  %v350_v18 = vld [vmem:[#allocation5 + $0x28] sm:$0xff]  ;;  %v453_v19 = vld [vmem:[#allocation7 + $0x40] sm:$0xff]  ;;  %p1139_p12 = scmp.lt.s32.totalorder %s1435_s21, %s1137_s30  ;;  %p1140_p13 = scmp.lt.s32.totalorder %s1138_s9, %s1132_s1 }
  0x6d   : > { %846 = vmatprep.subr.mxu0 %v357_v3  ;;  %878 = vmatpush3.msra.mxu1 %v459_v7  ;;  %v349_v20 = vld [vmem:[#allocation5 + $0x20] sm:$0xff]  ;;  %v452_v21 = vld [vmem:[#allocation7 + $0x38] sm:$0xff]  ;;  %v451_v23 = vld [vmem:[#allocation7 + $0x30] sm:$0xff]  ;;  %p1135_p9 = pneg %p1134_p11 }
  0x6e   : > { %847 = vmatpush3.msra.mxu0 %v357_v3  ;;  %879 = vmatprep.subr.mxu1 %v458_v9  ;;  %v348_v22 = vld [vmem:[#allocation5 + $0x18] sm:$0xff]  ;;  %v347_v24 = vld [vmem:[#allocation5 + $0x10] sm:$0xff]  ;;  %v450_v25 = vld [vmem:[#allocation7 + $0x28] sm:$0xff]  ;;  %p1141_p2 = por %p1140_p13, %p1139_p12 }
  0x6f   : > { %848 = vmatprep.subr.mxu0 %v356_v5  ;;  %880 = vmatpush3.msra.mxu1 %v458_v9  ;;  %v346_v26 = vld [vmem:[#allocation5 + $0x8] sm:$0xff]  ;;  %v449_v27 = vld [vmem:[#allocation7 + $0x20] sm:$0xff]  ;;  %v448_v30 = vld [vmem:[#allocation7 + $0x18] sm:$0xff] }
  0x70   : > { %849 = vmatpush3.msra.mxu0 %v356_v5  ;;  %881 = vmatprep.subr.mxu1 %v457_v11  ;;  %v345_v28 = vld [vmem:[#allocation5] sm:$0xff]  ;;  %v344_v29 = vld [vmem:[%s1407_s12 + $0x8] sm:$0xff]  ;;  %v447_v31 = vld [vmem:[#allocation7 + $0x10] sm:$0xff]  ;;  %s646_s12 = scalar_lea.sflag [#allocation4], %s1401_s19  ;;  %p1142_p5 = pnand %p1141_p2, %p1135_p9 }
  0x71   : > { %850 = vmatprep.subr.mxu0 %v355_v8  ;;  %882 = vmatpush3.msra.mxu1 %v457_v11  ;;  %v446_v32 = vld [vmem:[#allocation7 + $0x8] sm:$0xff]  ;;  %v445_v33 = vld [vmem:[#allocation7] sm:$0xff]  ;;  %v560_v34 = vld [vmem:[#allocation8 + $0x78] sm:$0xff] }
  0x72   : > { %851 = vmatpush3.msra.mxu0 %v355_v8  ;;  %883 = vmatprep.subr.mxu1 %v456_v13  ;;  %v559_v35 = vld [vmem:[#allocation8 + $0x70] sm:$0xff]  ;;  %v558_v36 = vld [vmem:[#allocation8 + $0x68] sm:$0xff]  ;;  %v557_v37 = vld [vmem:[#allocation8 + $0x60] sm:$0xff] }
  0x73   : > { %852 = vmatprep.subr.mxu0 %v354_v10  ;;  %884 = vmatpush3.msra.mxu1 %v456_v13  ;;  %v556_v38 = vld [vmem:[#allocation8 + $0x58] sm:$0xff]  ;;  %v555_v39 = vld [vmem:[#allocation8 + $0x50] sm:$0xff]  ;;  %v554_v40 = vld [vmem:[#allocation8 + $0x48] sm:$0xff] }
  0x74   : > { %853 = vmatpush3.msra.mxu0 %v354_v10  ;;  %885 = vmatprep.subr.mxu1 %v455_v15  ;;  %v553_v41 = vld [vmem:[#allocation8 + $0x40] sm:$0xff]  ;;  %v552_v42 = vld [vmem:[#allocation8 + $0x38] sm:$0xff]  ;;  %v551_v43 = vld [vmem:[#allocation8 + $0x30] sm:$0xff] }
  0x75   : > { %854 = vmatprep.subr.mxu0 %v353_v12  ;;  %886 = vmatpush3.msra.mxu1 %v455_v15  ;;  %v550_v44 = vld [vmem:[#allocation8 + $0x28] sm:$0xff]  ;;  %v549_v45 = vld [vmem:[#allocation8 + $0x20] sm:$0xff]  ;;  %v548_v53 = vld [vmem:[#allocation8 + $0x18] sm:$0xff] }
  0x76   : > { %855 = vmatpush3.msra.mxu0 %v353_v12  ;;  %887 = vmatprep.subr.mxu1 %v454_v17  ;;  %v776_v46 = vld [vmem:[%s1484_s2] ss:$0 sm:$0xff]  ;;  %v547_v54 = vld [vmem:[#allocation8 + $0x10] sm:$0xff]  ;;  %v546_v55 = vld [vmem:[#allocation8 + $0x8] sm:$0xff] }
  0x77   : > { %856 = vmatprep.subr.mxu0 %v352_v14  ;;  %888 = vmatpush3.msra.mxu1 %v454_v17  ;;  %v545_v56 = vld [vmem:[#allocation8] sm:$0xff] }
  0x78   : > { %857 = vmatpush3.msra.mxu0 %v352_v14  ;;  %889 = vmatprep.subr.mxu1 %v453_v19  ;;  %v777_v57 = vld [vmem:[%s1486_s4] ss:$0 sm:$0xff] }
  0x79   : > { %858 = vmatprep.subr.mxu0 %v351_v16  ;;  %890 = vmatpush3.msra.mxu1 %v453_v19  ;;  %v778_v0 = vld [vmem:[%s1488_s6] ss:$0 sm:$0xff] }
  0x7a   : > { %859 = vmatpush3.msra.mxu0 %v351_v16  ;;  %891 = vmatprep.subr.mxu1 %v452_v21 }
  0x7b   : > { %860 = vmatprep.subr.mxu0 %v350_v18  ;;  %892 = vmatpush3.msra.mxu1 %v452_v21 }
  0x7c   : > { %861 = vmatpush3.msra.mxu0 %v350_v18  ;;  %893 = vmatprep.subr.mxu1 %v451_v23 }
  0x7d   : > { %862 = vmatprep.subr.mxu0 %v349_v20  ;;  %894 = vmatpush3.msra.mxu1 %v451_v23 }
  0x7e   : > { %863 = vmatpush3.msra.mxu0 %v349_v20  ;;  %895 = vmatprep.subr.mxu1 %v450_v25 }
  0x7f   : > { %864 = vmatprep.subr.mxu0 %v348_v22  ;;  %896 = vmatpush3.msra.mxu1 %v450_v25 }
  0x80   : > { %865 = vmatpush3.msra.mxu0 %v348_v22  ;;  %897 = vmatprep.subr.mxu1 %v449_v27 }
  0x81   : > { %866 = vmatprep.subr.mxu0 %v347_v24  ;;  %898 = vmatpush3.msra.mxu1 %v449_v27 }
  0x82   : > { %867 = vmatpush3.msra.mxu0 %v347_v24  ;;  %899 = vmatprep.subr.mxu1 %v448_v30 }
  0x83   : > { %868 = vmatprep.subr.mxu0 %v346_v26  ;;  %900 = vmatpush3.msra.mxu1 %v448_v30 }
  0x84   : > { %869 = vmatpush3.msra.mxu0 %v346_v26  ;;  %901 = vmatprep.subr.mxu1 %v447_v31 }
  0x85   : > { %870 = vmatprep.subr.mxu0 %v345_v28  ;;  %902 = vmatpush3.msra.mxu1 %v447_v31 }
  0x86   : > { %871 = vmatpush3.msra.mxu0 %v345_v28  ;;  %903 = vmatprep.subr.mxu1 %v446_v32 }
  0x87   : > { %873 = vmatmul.mubr.f32.vlgmr.msra.gmra.mxu0 %v344_v29  ;;  %904 = vmatpush3.msra.mxu1 %v446_v32 }
  0x88   : > { %905 = vmatprep.subr.mxu1 %v445_v33  ;;  %910 = vmatprep.subr.mxu0 %v560_v34 }
  0x89   : > { %906 = vmatpush3.msra.mxu1 %v445_v33  ;;  %911 = vmatpush3.msra.mxu0 %v560_v34 }
  0x8a   : > { %912 = vmatprep.subr.mxu0 %v559_v35 }
  0x8b   : > { %913 = vmatpush3.msra.mxu0 %v559_v35 }
  0x8c   : > { %914 = vmatprep.subr.mxu0 %v558_v36 }
  0x8d   : > { %915 = vmatpush3.msra.mxu0 %v558_v36 }
  0x8e   : > { %916 = vmatprep.subr.mxu0 %v557_v37 }
  0x8f   : > { %917 = vmatpush3.msra.mxu0 %v557_v37 }
  0x90   : > { %918 = vmatprep.subr.mxu0 %v556_v38 }
  0x91   : > { %919 = vmatpush3.msra.mxu0 %v556_v38 }
  0x92   : > { %920 = vmatprep.subr.mxu0 %v555_v39 }
  0x93   : > { %921 = vmatpush3.msra.mxu0 %v555_v39 }
  0x94   : > { %922 = vmatprep.subr.mxu0 %v554_v40 }
  0x95   : > { %923 = vmatpush3.msra.mxu0 %v554_v40 }
  0x96   : > { %924 = vmatprep.subr.mxu0 %v553_v41 }
  0x97   : > { %925 = vmatpush3.msra.mxu0 %v553_v41 }
  0x98   : > { %926 = vmatprep.subr.mxu0 %v552_v42 }
  0x99   : > { %927 = vmatpush3.msra.mxu0 %v552_v42 }
  0x9a   : > { %928 = vmatprep.subr.mxu0 %v551_v43 }
  0x9b   : > { %929 = vmatpush3.msra.mxu0 %v551_v43 }
  0x9c   : > { %930 = vmatprep.subr.mxu0 %v550_v44 }
  0x9d   : > { %931 = vmatpush3.msra.mxu0 %v550_v44 }
  0x9e   : > { %932 = vmatprep.subr.mxu0 %v549_v45 }
  0x9f   : > { %933 = vmatpush3.msra.mxu0 %v549_v45 }
  0xa0   : > { %934 = vmatprep.subr.mxu0 %v548_v53 }
  0xa1   : > { %935 = vmatpush3.msra.mxu0 %v548_v53 }
  0xa2   : > { %936 = vmatprep.subr.mxu0 %v547_v54 }
  0xa3   : > { %937 = vmatpush3.msra.mxu0 %v547_v54 }
  0xa4   : > { %938 = vmatprep.subr.mxu0 %v546_v55 }
  0xa5   : > { %939 = vmatpush3.msra.mxu0 %v546_v55 }
  0xa6   : > { %940 = vmatprep.subr.mxu0 %v545_v56 }
  0xa7   : > { %941 = vmatpush3.msra.mxu0 %v545_v56 }
 0x147   : > { %v874_v47 = vpop.f32.mrf.mxu0 }
 0x148   : > { %v440_v48 = vadd.f32 %v874_v47, %v776_v46 }
 0x149   : > { %v434_v49 = vpop.f32.mrf.mxu0 }
 0x14a   : > { %v435_v50 = vadd.f32 %v776_v46, %v434_v49  ;;  %v444_v52 = vmax.f32 %v440_v48, 0.0 }
 0x14c   : > { %v443_v51 = vmax.f32 %v435_v50, 0.0 }
 0x14e   : > { %907 = vmatprep.mubr.f32.mxu1 %v443_v51 }
 0x14f   : > { %908 = vmatmul.mubr.f32.vlgmr.msra.gmra.mxu1 %v444_v52 }
 0x20f   : > { %v909_v58 = vpop.f32.mrf.mxu1 }
 0x210   : > { %v540_v59 = vadd.f32 %v909_v58, %v777_v57 }
 0x211   : > { %v534_v60 = vpop.f32.mrf.mxu1 }
 0x212   : > { %v535_v61 = vadd.f32 %v777_v57, %v534_v60  ;;  %v544_v63 = vmax.f32 %v540_v59, 0.0 }
 0x214   : > { %v543_v62 = vmax.f32 %v535_v61, 0.0 }
 0x216   : > { %942 = vmatprep.mubr.f32.mxu0 %v543_v62 }
 0x217   : > { %943 = vmatmul.mubr.f32.vlgmr.msra.gmra.mxu0 %v544_v63 }
 0x2d7   : > { %v944_v1 = vpop.f32.mrf.mxu0 }
 0x2d8   : > { %v640_v2 = vadd.f32 %v944_v1, %v778_v0 }
 0x2d9   : > { %v634_v3 = vpop.f32.mrf.mxu0 }
 0x2da   : > { %644 = vst [vmem:[%s340_s11 + $0x8] sm:$0xff] %v640_v2  ;;  %v635_v4 = vadd.f32 %v778_v0, %v634_v3 }
 0x2dc   : > { %643 = vst [vmem:[%s340_s11] sm:$0xff] %v635_v4 }
 0x2dd   : > { %1145 = shalt.err (!%p1142_p5)
}
 0x2de   : > { %s1146_s10 = scalar_lea.hbm %s1440_s16, 256  ;;  %s1150_s29 = scalar_lea.hbm %s1489_s7, 1024 }
 0x2df   : > { %p1147_p6 = scmp.ne.s32.totalorder %s1440_s16, %s1146_s10  ;;  %p1151_p0 = scmp.lt.s32.totalorder %s1440_s16, %s1489_s7 }
 0x2e0   : > { %p1152_p10 = scmp.lt.s32.totalorder %s1150_s29, %s1146_s10 }
 0x2e1   : > { %p1148_p4 = pnand %p1147_p6, %p1512_p1 }
 0x2e2   : > { %p1153_p3 = por %p1152_p10, %p1151_p0 }
 0x2e3   : > { %p1149_p8 = pneg %p1148_p4 }
 0x2e5   : > { %p1154_p7 = pnand %p1153_p3, %p1149_p8 }
 0x2e7   : > { %1157 = shalt.err (!%p1154_p7)
}
 0x2e8   : > { %s1213_s18 = smov 128   ;;  %s1214_s23 = smov 8  }
 0x2e9   : > { %959 = dma.vmem_to_hbm [thread:$0]  (%p1512_p1), %s1435_s21, 256, %s1440_s16, %s646_s12, %s1213_s18, %s1213_s18, %s1214_s23  }
 0x2ea PF: > { %p986_p11 = scmp.ge.s32.totalorder %s1204_s27, 2  ;;  %s674_s1 = sand.u32 1, %s1192_s24  }
 0x2eb   : > { %p1513_p9 = scmp.ne.s32.totalorder %s1498_s8, 0  ;;  %s675_s28 = scalar_lea.sflag [#allocation4], %s674_s1 }
 0x2ed   : > { %p976_p12 = pnand %p986_p11, %p1513_p9 }
 0x2ef   : > { %p977_p13 = pneg %p976_p12 }
 0x2f1   : > { %1187 = dma.done.wait (%p977_p13), %s675_s28, 256  }
 0x2f2   : > { %1189 = vsyncadd (%p977_p13), %s675_s28, 4294967040  ;;  %p22_p2 = scmp.ge.s32.totalorder %s1343_s14, 6   ;;  %s1514_s24 = smov %s1196_s25 }
 0x2f3   : > { %s1515_s25 = smov %s1200_s26  ;;  %s1516_s26 = smov %s1353_s17 }
 0x2f4   : > { %s1517_s27 = smov %s1343_s14  ;;  %24 = sbr.rel (!%p22_p2) target bundleno = 9 (0x9), region = 105 }
 0x2f9   :  { %680 = vsyncpa [#allocation3], 1 }
 0x2fa   :  { %682 = vsyncpa [#allocation3 + $0x1], 1 }
 0x2fb   :  { %683 = vsyncpa [#allocation6], 1 }
 0x2fc   :  { %684 = vsyncpa [#allocation9], 1 }
 0x2fd   :  { %685 = vsyncpa [#allocation4], 1 }
 0x2fe   :  { %687 = vsyncpa [#allocation4 + $0x1], 1 }

</bundles_post_ra>
